<compile_context>
chip_gen: v7x
topology: tpu7x:2x2x1
jax: 0.10.0
libtpu: 0.0.40
codegen_flags: <defaults>
</compile_context>

<pallas_src>
import functools

import jax
import jax.numpy as jnp
from jax.experimental import pallas as pl
from jax.experimental.pallas import tpu as pltpu


def _cdiv(a, b):
    return -(-a // b)


def _round_up(x, m):
    return ((x + m - 1) // m) * m


def _vmem_capacity_bytes():
    try:
        return int(pltpu.get_tpu_info().vmem_capacity_bytes)
    except Exception:
        return 64 * 1024 * 1024          # conservative: v7x per-core VMEM


def _compiler_params(dims, vmem_est_bytes):
    kwargs = dict(dimension_semantics=dims)
    # Raise the scoped-VMEM limit only above the smallest generation default
    # (16 MiB on v5e), and never above ~85% of physical VMEM (64 MiB on v7x).
    if vmem_est_bytes > 12 * 1024 * 1024:
        cap = int(0.85 * _vmem_capacity_bytes())
        kwargs["vmem_limit_bytes"] = max(
            min(int(vmem_est_bytes) + 4 * 1024 * 1024, cap), 16 * 1024 * 1024)
    return pltpu.CompilerParams(**kwargs)


# ----------------------------------------------------------------------------
# Pallas kernels
# ----------------------------------------------------------------------------
def _conv_pairs_kernel(pa_ref, t2_ref, w01_ref, w2_ref, b_ref, o_ref):
    # pa_ref : (1, tl, 2*C_in)  row t -> padded positions (2t, 2t+1) (taps 0,1)
    # t2_ref : (1, tl, C_in)    row t -> padded position 2t+2        (tap 2)
    # w01_ref: (2*C_in, C_out_p)   [W_tap0 ; W_tap1]
    # w2_ref : (C_in, C_out_p)     W_tap2
    # b_ref  : (1, C_out_p)
    # o_ref  : (1, tl, C_out_p)
    acc = jnp.dot(pa_ref[0], w01_ref[...], preferred_element_type=jnp.float32)
    acc = acc + jnp.dot(t2_ref[0], w2_ref[...], preferred_element_type=jnp.float32)
    o_ref[0] = (acc + b_ref[...]).astype(o_ref.dtype)


def _avgpool_matmul_kernel(x_ref, p_ref, o_ref, *, l_valid):
    # x_ref: (tm, Lt)   flattened (B*C, L) rows, length on lanes
    # p_ref: (Lt, Lt//2) pooling matrix, P[2t, t] = P[2t+1, t] = 0.5
    # o_ref: (tm, Lt//2)
    j = pl.program_id(1)
    lt = x_ref.shape[1]
    x = x_ref[...]
    cols = jax.lax.broadcasted_iota(jnp.int32, x.shape, 1)
    # Mask the boundary length tile so stale VMEM (NaN/Inf) never leaks into
    # valid outputs through the contraction.
    x = jnp.where(j * lt + cols < l_valid, x, jnp.zeros_like(x))
    o_ref[...] = jnp.dot(x, p_ref[...],
                         preferred_element_type=jnp.float32).astype(o_ref.dtype)


# ----------------------------------------------------------------------------
# Wrappers
# ----------------------------------------------------------------------------
def conv1d_down_pallas(x_ncl, weight, bias, padding=1, stride=2, max_tl=512):
    """Conv1d(k=3, stride=2, padding=padding) on NCL input, im2col-free."""
    B, C_in, L = x_ncl.shape
    C_out, C_in_w, K = weight.shape
    assert C_in_w == C_in and K == 3 and stride == 2
    L_out = (L + 2 * padding - K) // stride + 1
    assert L_out >= 1
    C_out_p = _round_up(C_out, 128)
    itemsize = jnp.dtype(x_ncl.dtype).itemsize

    # Length-tile sizing: bound per-step VMEM (double-buffered streams +
    # resident folded weights) under ~12 MiB, then balance tiles so length
    # padding is at most a few rows instead of up to tl-8.
    per_row = 2 * itemsize * (3 * C_in + C_out_p)
    fixed = 2 * itemsize * (3 * C_in * C_out_p + C_out_p)
    budget = 12 * 1024 * 1024
    # TODO(synk): for very large channel counts the folded weights alone can
    # exceed the budget; a K-tiled weight stream would be needed there.
    tl_cap = ((budget - fixed) // per_row) // 8 * 8 if budget > fixed + 8 * per_row else 8
    max_tl_eff = max(8, min(max_tl, tl_cap))
    n_lt = _cdiv(L_out, max_tl_eff)
    tl = _round_up(_cdiv(L_out, n_lt), 8)
    L_out_p = n_lt * tl

    # NCL -> NLC, pad once, derive the two tap views (one fused XLA copy each):
    #   x_pairs[b, t] = padded positions (2t, 2t+1)   (taps 0 and 1)
    #   x_tap2[b, t]  = padded position  2t+2         (tap 2 only)
    Lp_tot = 2 * L_out_p + 2
    right_pad = Lp_tot - padding - L                 # always >= padding >= 0
    x_nlc = jnp.transpose(x_ncl, (0, 2, 1))
    x_pad = jnp.pad(x_nlc, ((0, 0), (padding, right_pad), (0, 0)))
    x_pairs = x_pad[:, :2 * L_out_p, :].reshape(B, L_out_p, 2 * C_in)
    x_tap2 = x_pad[:, 2:2 * L_out_p + 2:2, :]        # (B, L_out_p, C_in)

    # Fold conv weights per tap: W_k = weight[:, :, k].T -> (C_in, C_out_p).
    w = jnp.transpose(weight, (2, 1, 0))             # (3, C_in, C_out)
    w = jnp.pad(w, ((0, 0), (0, 0), (0, C_out_p - C_out)))
    w01 = w[0:2].reshape(2 * C_in, C_out_p)          # [W0 ; W1]
    w2 = w[2]                                        # (C_in, C_out_p)
    b_mat = jnp.pad(bias, (0, C_out_p - C_out)).reshape(1, C_out_p)

    vmem_est = per_row * tl + fixed
    cost = pl.CostEstimate(
        flops=2 * B * L_out_p * (3 * C_in) * C_out_p,
        transcendentals=0,
        bytes_accessed=int(x_pairs.size + x_tap2.size + w01.size + w2.size
                           + b_mat.size + B * L_out_p * C_out_p) * itemsize,
    )

    out = pl.pallas_call(
        _conv_pairs_kernel,
        out_shape=jax.ShapeDtypeStruct((B, L_out_p, C_out_p), x_ncl.dtype),
        grid_spec=pltpu.PrefetchScalarGridSpec(
            num_scalar_prefetch=0,
            grid=(B, n_lt),
            in_specs=[
                pl.BlockSpec((1, tl, 2 * C_in), lambda b, j: (b, j, 0)),
                pl.BlockSpec((1, tl, C_in), lambda b, j: (b, j, 0)),
                pl.BlockSpec((2 * C_in, C_out_p), lambda b, j: (0, 0)),
                pl.BlockSpec((C_in, C_out_p), lambda b, j: (0, 0)),
                pl.BlockSpec((1, C_out_p), lambda b, j: (0, 0)),
            ],
            out_specs=pl.BlockSpec((1, tl, C_out_p), lambda b, j: (b, j, 0)),
        ),
        compiler_params=_compiler_params(("parallel", "parallel"), vmem_est),
        cost_estimate=cost,
    )(x_pairs, x_tap2, w01, w2, b_mat)

    out = out[:, :L_out, :C_out]
    # TODO(synk): the slice+transpose back to NCL is one fused XLA copy over
    # the (small) output; drop it if the surrounding model can consume NLC.
    # TODO(synk): cast activations/weights to bf16 (f32 accumulation) when the
    # surrounding model tolerates it, for ~2x MXU throughput on v6e/v7x.
    return jnp.transpose(out, (0, 2, 1))


def avgpool1d_down_pallas(x_ncl, max_lt=512, max_tm=512):
    """AvgPool1d(kernel=2, stride=2) on NCL input, no layout transposes."""
    B, C, L = x_ncl.shape
    L_out = L // 2
    assert L_out >= 1
    L_even = 2 * L_out
    rows = B * C

    x2 = x_ncl.reshape(rows, L)                      # free, NCL-native
    if L_even != L:
        x2 = x2[:, :L_even]                          # only when L is odd

    lt = L_even if L_even <= max_lt else max_lt      # max_lt multiple of 256
    n_l = _cdiv(L_even, lt)

    tm = rows if rows <= max_tm else max_tm
    n_r = _cdiv(rows, tm)
    # v7x has 2 TensorCores: ensure >= 2 grid steps when there is enough work.
    if n_r * n_l == 1 and rows >= 16:
        tm = _round_up(_cdiv(rows, 2), 8)
        n_r = _cdiv(rows, tm)

    t_idx = jnp.arange(lt, dtype=jnp.int32)[:, None]
    o_idx = jnp.arange(lt // 2, dtype=jnp.int32)[None, :]
    pool_mat = ((t_idx // 2) == o_idx).astype(x_ncl.dtype) * jnp.asarray(0.5, x_ncl.dtype)

    kernel = functools.partial(_avgpool_matmul_kernel, l_valid=L_even)
    out = pl.pallas_call(
        kernel,
        out_shape=jax.ShapeDtypeStruct((rows, L_out), x_ncl.dtype),
        grid_spec=pltpu.PrefetchScalarGridSpec(
            num_scalar_prefetch=0,
            grid=(n_r, n_l),
            in_specs=[pl.BlockSpec((tm, lt), lambda i, j: (i, j)),
                      pl.BlockSpec((lt, lt // 2), lambda i, j: (0, 0))],
            out_specs=pl.BlockSpec((tm, lt // 2), lambda i, j: (i, j)),
        ),
        compiler_params=pltpu.CompilerParams(
            dimension_semantics=("parallel", "parallel")),
    )(x2, pool_mat)

    return out.reshape(B, C, L_out)


class Downsample1D:
    """JAX/Pallas port of diffusers' Downsample1D (forward only)."""

    def __init__(self, channels, out_channels=None, use_conv=False, padding=1,
                 name="conv", *, key=None, dtype=jnp.float32):
        self.channels = channels
        self.out_channels = out_channels if out_channels is not None else channels
        self.use_conv = use_conv
        self.padding = padding
        self.name = name
        if use_conv:
            key = jax.random.PRNGKey(0) if key is None else key
            kw, kb = jax.random.split(key)
            fan_in = channels * 3
            bound = 1.0 / (fan_in ** 0.5)            # nn.Conv1d default init range
            self.weight = jax.random.uniform(
                kw, (self.out_channels, channels, 3), dtype, -bound, bound)
            self.bias = jax.random.uniform(
                kb, (self.out_channels,), dtype, -bound, bound)
        else:
            assert self.channels == self.out_channels
            self.weight = None
            self.bias = None

    def __call__(self, inputs):
        assert inputs.shape[1] == self.channels
        if self.use_conv:
            return conv1d_down_pallas(inputs, self.weight, self.bias,
                                      padding=self.padding, stride=2)
        return avgpool1d_down_pallas(inputs)


# ----------------------------------------------------------------------------
# Reference implementations (pure JAX) for verification
# ----------------------------------------------------------------------------
def _ref_conv(x_ncl, weight, bias, padding):
    y = jax.lax.conv_general_dilated(
        x_ncl, weight, window_strides=(2,), padding=[(padding, padding)],
        dimension_numbers=("NCH", "OIH", "NCH"))
    return y + bias[None, :, None]


def _ref_avgpool(x_ncl):
    B, C, L = x_ncl.shape
    L_out = L // 2
    return x_ncl[:, :, : 2 * L_out].reshape(B, C, L_out, 2).mean(axis=-1)


if __name__ == "__main__":
    key = jax.random.PRNGKey(0)
    kx, kp, kx2 = jax.random.split(key, 3)

    # Small shapes: channels=4 -> out_channels=8, length 16 -> 8 (stride 2, pad 1)
    B, C, L = 2, 4, 16
    x = jax.random.normal(kx, (B, C, L), jnp.float32)

    down_conv = Downsample1D(channels=C, out_channels=8, use_conv=True,
                             padding=1, key=kp)
    y_conv = jax.block_until_ready(down_conv(x))
    y_conv_ref = _ref_conv(x, down_conv.weight, down_conv.bias, padding=1)
    assert y_conv.shape == (B, 8, 8)
    assert jnp.allclose(y_conv, y_conv_ref, atol=1e-5, rtol=1e-5)

    down_pool = Downsample1D(channels=C, use_conv=False)
    y_pool = jax.block_until_ready(down_pool(x))
    y_pool_ref = _ref_avgpool(x)
    assert y_pool.shape == (B, C, L // 2)
    assert jnp.allclose(y_pool, y_pool_ref, atol=1e-5, rtol=1e-5)

    # Longer length to exercise multi-tile grids and boundary masking.
    L2 = 1200
    x_big = jax.random.normal(kx2, (B, C, L2), jnp.float32)
    y_conv2 = jax.block_until_ready(down_conv(x_big))
    y_conv2_ref = _ref_conv(x_big, down_conv.weight, down_conv.bias, padding=1)
    assert jnp.allclose(y_conv2, y_conv2_ref, atol=1e-5, rtol=1e-5)
    y_pool2 = jax.block_until_ready(down_pool(x_big))
    assert jnp.allclose(y_pool2, _ref_avgpool(x_big), atol=1e-5, rtol=1e-5)

    print("KERNEL_OK")
</pallas_src>

<mosaic_0001>
module attributes {stable_mosaic.version = 11 : i64} {
  func.func @_conv_pairs_kernel(%arg0: i32, %arg1: i32, %arg2: memref<1x8x8xf32, #tpu.memory_space<vmem>>, %arg3: memref<1x8x4xf32, #tpu.memory_space<vmem>>, %arg4: memref<8x128xf32, #tpu.memory_space<vmem>>, %arg5: memref<4x128xf32, #tpu.memory_space<vmem>>, %arg6: memref<1x128xf32, #tpu.memory_space<vmem>>, %arg7: memref<1x8x128xf32, #tpu.memory_space<vmem>>) attributes {dimension_semantics = [#tpu.dimension_semantics<parallel>, #tpu.dimension_semantics<parallel>], iteration_bounds = array<i64: 2, 1>, scalar_prefetch = 0 : i64, scratch_operands = 0 : i64, tpu.core_type = #tpu.core_type<tc>, window_params = [{transform_indices = @transform_0, window_bounds = array<i64: 1, 8, 8>}, {transform_indices = @transform_1, window_bounds = array<i64: 1, 8, 4>}, {pipeline_mode = #tpu.pipeline_mode<synchronous>, transform_indices = @transform_2, window_bounds = array<i64: 8, 128>}, {pipeline_mode = #tpu.pipeline_mode<synchronous>, transform_indices = @transform_3, window_bounds = array<i64: 4, 128>}, {pipeline_mode = #tpu.pipeline_mode<synchronous>, transform_indices = @transform_4, window_bounds = array<i64: 1, 128>}, {transform_indices = @transform_5, window_bounds = array<i64: 1, 8, 128>}]} {
    %c0 = arith.constant 0 : index
    %c0_0 = arith.constant 0 : index
    %c0_1 = arith.constant 0 : index
    %0 = vector.load %arg2[%c0, %c0_0, %c0_1] : memref<1x8x8xf32, #tpu.memory_space<vmem>>, vector<1x8x8xf32>
    %1 = vector.shape_cast %0 : vector<1x8x8xf32> to vector<8x8xf32>
    %c0_2 = arith.constant 0 : index
    %c0_3 = arith.constant 0 : index
    %2 = vector.load %arg4[%c0_2, %c0_3] : memref<8x128xf32, #tpu.memory_space<vmem>>, vector<8x128xf32>
    %cst = arith.constant dense<0.000000e+00> : vector<8x128xf32>
    %3 = tpu.matmul %1, %2, %cst {dimension_numbers = #tpu.dot_dimension_numbers<[1], [0], [0], [1], [0, 0, 1, 1], [], []>} : vector<8x8xf32>, vector<8x128xf32>, vector<8x128xf32> -> vector<8x128xf32>
    %c0_4 = arith.constant 0 : index
    %c0_5 = arith.constant 0 : index
    %c0_6 = arith.constant 0 : index
    %4 = vector.load %arg3[%c0_4, %c0_5, %c0_6] : memref<1x8x4xf32, #tpu.memory_space<vmem>>, vector<1x8x4xf32>
    %5 = vector.shape_cast %4 : vector<1x8x4xf32> to vector<8x4xf32>
    %c0_7 = arith.constant 0 : index
    %c0_8 = arith.constant 0 : index
    %6 = vector.load %arg5[%c0_7, %c0_8] : memref<4x128xf32, #tpu.memory_space<vmem>>, vector<4x128xf32>
    %cst_9 = arith.constant dense<0.000000e+00> : vector<8x128xf32>
    %7 = tpu.matmul %5, %6, %cst_9 {dimension_numbers = #tpu.dot_dimension_numbers<[1], [0], [0], [1], [0, 0, 1, 1], [], []>} : vector<8x4xf32>, vector<4x128xf32>, vector<8x128xf32> -> vector<8x128xf32>
    %8 = arith.addf %3, %7 : vector<8x128xf32>
    %c0_10 = arith.constant 0 : index
    %c0_11 = arith.constant 0 : index
    %9 = vector.load %arg6[%c0_10, %c0_11] : memref<1x128xf32, #tpu.memory_space<vmem>>, vector<1x128xf32>
    %10 = vector.broadcast %9 : vector<1x128xf32> to vector<8x128xf32>
    %11 = arith.addf %8, %10 : vector<8x128xf32>
    %c0_12 = arith.constant 0 : index
    %c0_13 = arith.constant 0 : index
    %c0_14 = arith.constant 0 : index
    %12 = vector.load %arg7[%c0_12, %c0_13, %c0_14] : memref<1x8x128xf32, #tpu.memory_space<vmem>>, vector<1x8x128xf32>
    %13 = vector.shape_cast %12 : vector<1x8x128xf32> to vector<8x128xf32>
    %14 = vector.shape_cast %11 : vector<8x128xf32> to vector<1x8x128xf32>
    tpu.vector_store %arg7[%c0_12, %c0_13, %c0_14], %14 {strides = array<i32>} : memref<1x8x128xf32, #tpu.memory_space<vmem>>, vector<1x8x128xf32>,
    return
  }
  func.func @transform_0(%arg0: i32, %arg1: i32) -> (i32, i32, i32) {
    %c0_i32 = arith.constant 0 : i32
    %c0_i32_0 = arith.constant 0 : i32
    return %arg0, %arg1, %c0_i32 : i32, i32, i32
  }
  func.func @transform_1(%arg0: i32, %arg1: i32) -> (i32, i32, i32) {
    %c0_i32 = arith.constant 0 : i32
    %c0_i32_0 = arith.constant 0 : i32
    return %arg0, %arg1, %c0_i32 : i32, i32, i32
  }
  func.func @transform_2(%arg0: i32, %arg1: i32) -> (i32, i32) {
    %c0_i32 = arith.constant 0 : i32
    %c0_i32_0 = arith.constant 0 : i32
    %c0_i32_1 = arith.constant 0 : i32
    return %c0_i32, %c0_i32_0 : i32, i32
  }
  func.func @transform_3(%arg0: i32, %arg1: i32) -> (i32, i32) {
    %c0_i32 = arith.constant 0 : i32
    %c0_i32_0 = arith.constant 0 : i32
    %c0_i32_1 = arith.constant 0 : i32
    return %c0_i32, %c0_i32_0 : i32, i32
  }
  func.func @transform_4(%arg0: i32, %arg1: i32) -> (i32, i32) {
    %c0_i32 = arith.constant 0 : i32
    %c0_i32_0 = arith.constant 0 : i32
    %c0_i32_1 = arith.constant 0 : i32
    return %c0_i32, %c0_i32_0 : i32, i32
  }
  func.func @transform_5(%arg0: i32, %arg1: i32) -> (i32, i32, i32) {
    %c0_i32 = arith.constant 0 : i32
    %c0_i32_0 = arith.constant 0 : i32
    return %arg0, %arg1, %c0_i32 : i32, i32, i32
  }
}

</mosaic_0001>

<bundles_post_ra>
// kernel: tpu_custom_call.1
= control target key start
LH: loop header
LB: loop body
LE: loop exit
PB: predicated region body
PF: predicated region fallthrough
CT: control target
= control target key end

     0   :  { %10 = vsyncpa [#allocation3], 0  ;;  %s863_s0 = inlined_call_operand.vmem [shape: f32[2,8,8], index: 0, kind: input, shape index: {}]   ;;  %s864_s1 = inlined_call_operand.vmem [shape: f32[2,8,4], index: 1, kind: input, shape index: {}]   ;;  %s865_s2 = inlined_call_operand.vmem [shape: f32[8,128], index: 2, kind: input, shape index: {}]   ;;  %s866_s3 = inlined_call_operand.vmem [shape: f32[4,128], index: 3, kind: input, shape index: {}]   ;;  %s867_s4 = inlined_call_operand.vmem [shape: f32[1,128], index: 4, kind: input, shape index: {}]   ;;  %s868_s5 = inlined_call_operand.hbm [shape: f32[2,8,128], index: 5, kind: output, shape index: {}]  }
   0x1   :  { %12 = vsyncpa [#allocation3 + $0x1], 0  ;;  %s739_s18 = smov 0   ;;  %s741_s19 = smov 0  }
   0x2   :  { %s743_s20 = smov 0   ;;  %s745_s21 = smov 0  }
   0x3   :  { %s747_s22 = smov 0   ;;  %s749_s23 = smov 0  }
   0x4 LB: > { %s539_s24 = sadd.s32 4294967295, %s704_s23   ;;  %s540_s25 = sadd.s32 4294967294, %s704_s23   ;;  %s704_s23 = sphi %s749_s23, %s18_s23   ;;  %s700_s22 = sphi %s747_s22, %s875_s22   ;;  %s696_s21 = sphi %s745_s21, %s874_s21   ;;  %s692_s20 = sphi %s743_s20, %s873_s20   ;;  %s688_s19 = sphi %s741_s19, %s872_s19   ;;  %s684_s18 = sphi %s739_s18, %s871_s18  }
   0x5   : > { %s30_s26 = sadd.s32 1, %s700_s22  ;;  %s158_s27 = sadd.s32 1, %s692_s20 }
   0x6   : > { %p32_p0 = scmp.ge.s32.totalorder %s30_s26, 2  ;;  %p168_p1 = scmp.ne.s32.totalorder %s692_s20, %s688_s19 }
   0x7   : > { %p169_p2 = scmp.eq.s32.totalorder %s539_s24, 1  ;;  %p174_p3 = scmp.ne.s32.totalorder %s688_s19, %s684_s18 }
   0x8   : > { %s877_s26 = smov (%p32_p0, %s30_s26), 0  ;;  %p175_p5 = scmp.eq.s32.totalorder %s540_s25, 1 }
   0x9   : > { %p779_p4 = por %p169_p2, %p168_p1  ;;  %s153_s29 = ssub.s32 %s700_s22, %s877_s26 }
   0xa   : > { %p543_p6 = scmp.ge.s32.totalorder %s704_s23, 1  ;;  %p156_p7 = scmp.eq.s32.totalorder %s153_s29, 0 }
   0xb   : > { %p786_p8 = por %p175_p5, %p174_p3  ;;  %p222_p9 = scmp.lt.s32.totalorder %s704_s23, 3 }
   0xc   : > { %s792_s6 = scalar_select %p156_p7, %s692_s20, %s158_s27  }
   0xd   : > { %p223_p10 = pnand %p543_p6, %p222_p9 }
   0xe   : > { %v276_v0 = vld [vmem:[%s866_s3] sm:$0xf] (!%p223_p10)  ;;  %vm281_vm0 = vcmask (!%p223_p10), 1043456   ;;  %v706_v2 = vmov (!%p223_p10), 0.0   ;;  %p259_p11 = scmp.lt.s32.totalorder (!%p223_p10), %s696_s21, 1  ;;  %vm707_vm1 = vmmov (!%p223_p10), 0  }
   0xf   : > { %226 = sbr.rel (%p223_p10) target bundleno = 258 (0x102), region = 40  ;;  %v274_v1 = vld [vmem:[%s865_s2] sm:$0xff] (!%p223_p10)  ;;  %559 = vmatprep.subr.mxu0 (!%p223_p10), %v706_v2  ;;  %564 = vmatprep.subr.mxu1 (!%p223_p10), %v706_v2  ;;  %vm277_vm2 = vcmask (!%p223_p10), 31744   ;;  %vm355_vm3 = vcmask (!%p223_p10), 64512   ;;  %s256_s25 = sand.u32 (!%p223_p10), 1, %s688_s19  }
  0x10   : > { %560 = vmatpush3.msk.msra.mxu0 (!%p223_p10), %vm281_vm0, %v276_v0  ;;  %561 = vmatprep.mubr.msk.f32.mxu0 (!%p223_p10), %vm707_vm1, %v706_v2  ;;  %s544_s27 = sshll.u32 (!%p223_p10), %s256_s25, 3  ;;  %v550_v7 = vld [vmem:[%s867_s4] ss:$0 sm:$0xff] (!%p223_p10)  ;;  %s552_s8 = sshll.u32 (!%p223_p10), %s696_s21, 7 }
  0x11   : > { %565 = vmatpush3.msra.mxu1 (!%p223_p10), %v274_v1  ;;  %566 = vmatprep.mubr.msk.f32.mxu1 (!%p223_p10), %vm707_vm1, %v706_v2  ;;  %s258_s9 = scalar_lea.vmem (!%p223_p10), [#allocation2], %s544_s27  ;;  %s816_s13 = scalar_lea.hbm (!%p223_p10), %s868_s5, %s552_s8 }
  0x12   : > { %s453_s10 = sshll.u32 (!%p223_p10), %s258_s9, 4  ;;  %s439_s14 = scalar_lea.sflag (!%p223_p10), [#allocation3], %s256_s25  ;;  %s818_s10 = int_to_ptr.vmem [resolvable:$true] %s453_s10 }
  0x16   : > { %s260_s11 = scalar_select %p259_p11, %s696_s21, 1 }
  0x17   : > { %s708_s21 = smov [#allocation2]  }
  0x18   : > { %s545_s12 = sshll.u32 %s260_s11, 3  ;;  %s630_s16 = sshll.u32 %s708_s21, 4  ;;  %s631_s16 = int_to_ptr.vmem [resolvable:$false] %s630_s16 }
  0x19   : > { %s272_s15 = scalar_lea.vmem %s864_s1, %s545_s12  ;;  %s265_s24 = scalar_lea.vmem %s863_s0, %s545_s12 }
  0x1a   : > { %v275_v3 = vld [vmem:[%s272_s15] sm:$0xff]  ;;  %s626_s15 = scalar_lea.vmem %s818_s10, 128  ;;  %s632_s17 = scalar_lea.vmem %s631_s16, 256 }
  0x1b   : > { %v273_v4 = vld [vmem:[%s265_s24] sm:$0xff]  ;;  %562 = vmatmul.mubr.msk.f32.vlgmr.msra.gmra.mrb[0].mxu0 %vm277_vm2, %v275_v3  ;;  %p627_p12 = scmp.ne.s32.totalorder %s818_s10, %s626_s15  ;;  %p633_p1 = scmp.lt.s32.totalorder %s818_s10, %s631_s16 }
  0x1c   : > { %567 = vmatmul.mubr.msk.f32.vlgmr.msra.gmra.mrb[0].mxu1 %vm355_vm3, %v273_v4  ;;  %p634_p2 = scmp.lt.s32.totalorder %s632_s17, %s626_s15 }
  0x1d   : > { %p628_p13 = pnand %p627_p12, %p779_p4 }
  0x1e   : > { %p635_p3 = por %p634_p2, %p633_p1 }
  0x1f   : > { %p629_p0 = pneg %p628_p13 }
  0x21   : > { %p636_p5 = pnand %p635_p3, %p629_p0 }
  0xee   : > { %v351_v5 = vpop.f32.mrb[0].mxu0 }
  0xef   : > { %v425_v6 = vpop.f32.mrb[0].mxu1  ;;  %v563_v9 = vpop.f32.mrb[1].mxu0 }
  0xf0   : > { %v426_v8 = vadd.f32 %v425_v6, %v351_v5  ;;  %v568_v10 = vpop.f32.mrb[1].mxu1 }
  0xf2   : > { %v436_v11 = vadd.f32 %v550_v7, %v426_v8 }
  0xf4   : > { %437 = vst [vmem:[%s258_s9] sm:$0xff] %v436_v11 }
  0xf5   : > { %639 = shalt.err (!%p636_p5)
}
  0xf6   : > { %s640_s24 = scalar_lea.hbm %s816_s13, 128  ;;  %s644_s29 = scalar_lea.hbm %s868_s5, 256 }
  0xf7   : > { %p641_p6 = scmp.ne.s32.totalorder %s816_s13, %s640_s24  ;;  %p645_p10 = scmp.lt.u32.totalorder %s816_s13, %s868_s5 }
  0xf8   : > { %p646_p11 = scmp.lt.u32.totalorder %s644_s29, %s640_s24  ;;  %p648_p13 = scmp.lt.u32.totalorder %s640_s24, %s816_s13 }
  0xf9   : > { %p642_p7 = pnand %p641_p6, %p779_p4 }
  0xfa   : > { %p647_p12 = por %p646_p11, %p645_p10 }
  0xfb   : > { %p643_p9 = pneg %p642_p7 }
  0xfc   : > { %p649_p0 = por %p648_p13, %p647_p12 }
  0xfe   : > { %p650_p1 = pnand %p649_p0, %p643_p9 }
 0x100   : > { %653 = shalt.err (!%p650_p1)
}
 0x101   : > { %569 = dma.vmem_to_hbm [thread:$0]  (%p779_p4), %s818_s10, 128, %s816_s13, %s439_s14  }
 0x102 PF: > { %p575_p2 = scmp.ge.s32.totalorder %s704_s23, 2  ;;  %s465_s9 = sand.u32 1, %s684_s18  }
 0x103   : > { %s466_s11 = scalar_lea.sflag [#allocation3], %s465_s9 }
 0x104   : > { %p572_p3 = pnand %p575_p2, %p786_p8 }
 0x106   : > { %679 = dma.done.wait (!%p572_p3), %s466_s11, 128  }
 0x107   : > { %681 = vsyncadd (!%p572_p3), %s466_s11, 4294967168  ;;  %s18_s23 = sadd.s32 1, %s704_s23   ;;  %s871_s18 = smov %s688_s19 }
 0x108   : > { %p15_p5 = scmp.ge.s32.totalorder %s18_s23, 4   ;;  %s872_s19 = smov %s692_s20 }
 0x109   : > { %s873_s20 = smov %s792_s6  ;;  %s874_s21 = smov %s700_s22 }
 0x10a   : > { %s875_s22 = smov %s877_s26  ;;  %17 = sbr.rel (!%p15_p5) target bundleno = 4 (0x4), region = 78 }
 0x111   :  { %471 = vsyncpa [#allocation3], 1 }
 0x112   :  { %473 = vsyncpa [#allocation3 + $0x1], 1 }

</bundles_post_ra>
